<compile_context>
chip_gen: v7x
topology: tpu7x:2x2x1
jax: 0.10.0
libtpu: 0.0.40
codegen_flags: <defaults>
</compile_context>

<pallas_src>
import functools

import jax
import jax.numpy as jnp
from jax import lax
from jax.experimental import pallas as pl
from jax.experimental.pallas import tpu as pltpu


# ---------------------------------------------------------------------------
# Kernel
# ---------------------------------------------------------------------------
def _sdpa_kernel(*refs, has_mask, return_attn, inv_temper, mxu_dtype):
    i = 0
    mask = None
    if has_mask:
        mask = refs[i][0]            # (tq, Lk) int8, nonzero == masked out
        i += 1
    q = refs[i][0]                   # (tq, D)
    k = refs[i + 1][0]               # (Lk, D)   resident per batch element
    v = refs[i + 2][0]               # (Lk, Dv)  resident per batch element
    i += 3
    out_ref = refs[i]
    attn_ref = refs[i + 1] if return_attn else None

    # Fold the 1/sqrt(d_model) scale into the small (tq, D) q tile, then feed the MXU
    # bf16 operands while accumulating in f32.
    q_s = (q.astype(jnp.float32) * jnp.float32(inv_temper)).astype(mxu_dtype)
    s = lax.dot_general(
        q_s, k.astype(mxu_dtype),
        dimension_numbers=(((1,), (1,)), ((), ())),   # contract feature dim of both
        preferred_element_type=jnp.float32,
    )

    if mask is not None:
        # torch: attn.masked_fill_(attn_mask, -inf)  (True == masked out)
        # NOTE: a fully-masked row yields NaN, matching the torch reference semantics.
        s = jnp.where(mask != 0, -jnp.inf, s)

    # numerically-stable softmax over the key axis (f32 throughout)
    m = jnp.max(s, axis=-1, keepdims=True)
    e = jnp.exp(s - m)
    denom = jnp.sum(e, axis=-1, keepdims=True)
    p = e * pl.reciprocal(denom, approx=False)

    # TODO(synk): attention dropout (train=True) needs a PRNG mask; eval mode is identity.

    o = jnp.dot(p.astype(mxu_dtype), v.astype(mxu_dtype),
                preferred_element_type=jnp.float32)

    out_ref[0] = o.astype(out_ref.dtype)
    if attn_ref is not None:
        attn_ref[0] = p.astype(attn_ref.dtype)


# ---------------------------------------------------------------------------
# Wrapper
# ---------------------------------------------------------------------------
def _round_up(x, m):
    return ((x + m - 1) // m) * m


def scaled_dot_product_attention(q, k, v, attn_mask=None, *, d_model=None,
                                 return_attn=True, attn_dtype=None, tq=None,
                                 mxu_dtype=jnp.bfloat16):
    """q: (B, Lq, D), k: (B, Lk, D), v: (B, Lk, Dv); attn_mask: (B, Lq, Lk) bool (True = masked)."""
    B, Lq, D = q.shape
    Bk, Lk, Dk = k.shape
    Bv, Lv, Dv = v.shape
    assert (Bk, Dk) == (B, D) and (Bv, Lv) == (B, Lk)
    if attn_mask is not None:
        assert attn_mask.shape == (B, Lq, Lk), (
            f"Attention mask shape {attn_mask.shape} mismatch with logits {(B, Lq, Lk)}")

    if d_model is None:
        d_model = D                        # LAL-Parser passes d_model = d_k
    inv_temper = 1.0 / (float(d_model) ** 0.5)
    if attn_dtype is None:
        attn_dtype = q.dtype

    # --- per-chip tile / VMEM budget ---------------------------------------
    try:
        vmem_cap = int(getattr(pltpu.get_tpu_info(), "vmem_capacity_bytes", 64 * 2**20))
    except Exception:
        vmem_cap = 64 * 2**20              # conservative (v7x per-TC) fallback
    tq_cap = 256 if vmem_cap <= 64 * 2**20 else 512   # v7x vs v5e/v6e
    if tq is None:
        tq = min(tq_cap, _round_up(Lq, 32))
    tq = max(32, _round_up(tq, 32))        # multiple of 32: int8-mask-tile friendly

    # Pad Lq up to a tile multiple (robust for any Lq; padded rows are sliced off).
    Lq_pad = _round_up(Lq, tq)
    pad_q = Lq_pad - Lq
    if pad_q:
        q = jnp.pad(q, ((0, 0), (0, pad_q), (0, 0)))
    grid = (B, Lq_pad // tq)

    # --- specs ---------------------------------------------------------------
    q_spec = pl.BlockSpec((1, tq, D), lambda b, i: (b, i, 0))
    k_spec = pl.BlockSpec((1, Lk, D), lambda b, i: (b, 0, 0))    # resident per batch element
    v_spec = pl.BlockSpec((1, Lk, Dv), lambda b, i: (b, 0, 0))   # resident per batch element

    out_shape = [jax.ShapeDtypeStruct((B, Lq_pad, Dv), q.dtype)]
    out_specs = [pl.BlockSpec((1, tq, Dv), lambda b, i: (b, i, 0))]
    if return_attn:
        out_shape.append(jax.ShapeDtypeStruct((B, Lq_pad, Lk), attn_dtype))
        out_specs.append(pl.BlockSpec((1, tq, Lk), lambda b, i: (b, i, 0)))
    out_shape = tuple(out_shape)
    out_specs = tuple(out_specs)

    in_specs = [q_spec, k_spec, v_spec]
    operands = [q, k, v]
    if attn_mask is not None:
        mask_i8 = attn_mask.astype(jnp.int8)                     # 4x smaller than int32
        if pad_q:
            mask_i8 = jnp.pad(mask_i8, ((0, 0), (0, pad_q), (0, 0)))  # pad = unmasked
        in_specs = [pl.BlockSpec((1, tq, Lk), lambda b, i: (b, i, 0))] + in_specs
        operands = [mask_i8] + operands

    # --- VMEM budget (tile footprint, double-buffered I/O + f32/bf16 temporaries) ----
    itemsize = jnp.dtype(q.dtype).itemsize
    attn_itemsize = jnp.dtype(attn_dtype).itemsize
    in_tile = (tq * D + Lk * D + Lk * Dv) * itemsize
    if attn_mask is not None:
        in_tile += tq * Lk                                        # int8 mask tile
    out_tile = tq * Dv * itemsize + (tq * Lk * attn_itemsize if return_attn else 0)
    scratch = (3 * tq * Lk * 4                                    # s, e, p in f32
               + (tq * D + Lk * D + tq * Lk + Lk * Dv) * 2        # bf16 MXU operand copies
               + tq * Dv * 4)                                     # f32 PV accumulator
    vmem_needed = 2 * (in_tile + out_tile) + scratch + (4 << 20)  # + headroom
    vmem_limit = int(min(max(vmem_needed, 32 << 20), (vmem_cap * 3) // 4))

    compiler_params = pltpu.CompilerParams(
        dimension_semantics=("parallel", "parallel"),   # batch x q-tiles: megacore-shardable
        vmem_limit_bytes=vmem_limit,
    )

    bytes_accessed = sum(int(x.size) * jnp.dtype(x.dtype).itemsize for x in operands)
    bytes_accessed += B * Lq_pad * Dv * itemsize
    if return_attn:
        bytes_accessed += B * Lq_pad * Lk * attn_itemsize
    cost = pl.CostEstimate(
        flops=2 * B * Lq_pad * Lk * (D + Dv),
        transcendentals=B * Lq_pad * Lk,
        bytes_accessed=bytes_accessed,
    )

    kernel = functools.partial(
        _sdpa_kernel,
        has_mask=attn_mask is not None,
        return_attn=return_attn,
        inv_temper=inv_temper,
        mxu_dtype=mxu_dtype,
    )
    grid_spec = pltpu.PrefetchScalarGridSpec(
        num_scalar_prefetch=0, grid=grid,
        in_specs=in_specs, out_specs=out_specs,
    )
    results = pl.pallas_call(
        kernel, out_shape=out_shape, grid_spec=grid_spec,
        compiler_params=compiler_params, cost_estimate=cost,
    )(*operands)

    if return_attn:
        out, attn = results
        return out[:, :Lq], attn[:, :Lq]
    (out,) = results
    return out[:, :Lq]


# ---------------------------------------------------------------------------
# Pure-JAX reference
# ---------------------------------------------------------------------------
def reference(q, k, v, attn_mask=None, d_model=None):
    if d_model is None:
        d_model = q.shape[-1]
    temper = float(d_model) ** 0.5
    attn = jnp.einsum("bqd,bkd->bqk", q, k,
                      precision=lax.Precision.HIGHEST) / temper
    if attn_mask is not None:
        attn = jnp.where(attn_mask, -jnp.inf, attn)
    attn = jax.nn.softmax(attn, axis=-1)
    out = jnp.einsum("bqk,bkd->bqd", attn, v,
                     precision=lax.Precision.HIGHEST)
    return out, attn


# ---------------------------------------------------------------------------
# Demo / self-test
# ---------------------------------------------------------------------------
if __name__ == "__main__":
    # (n_head * batch, len_q, len_k, d_k) — small, lane-dense (128-wide last dims)
    B, Lq, Lk, D = 2, 128, 128, 128

    key = jax.random.PRNGKey(0)
    kq, kk, kv = jax.random.split(key, 3)
    q = jax.random.normal(kq, (B, Lq, D), dtype=jnp.float32)
    k = jax.random.normal(kk, (B, Lk, D), dtype=jnp.float32)
    v = jax.random.normal(kv, (B, Lk, D), dtype=jnp.float32)

    # padding mask (True = masked): batch 0 sees all keys, batch 1 only the first 96
    valid = jnp.array([Lk, 96], dtype=jnp.int32)
    key_ids = jnp.arange(Lk, dtype=jnp.int32)
    attn_mask = jnp.broadcast_to(
        key_ids[None, None, :] >= valid[:, None, None], (B, Lq, Lk))

    atol = rtol = 2e-2   # bf16 MXU operands (accumulation in f32)

    # --- unmasked path ---
    out, attn = scaled_dot_product_attention(q, k, v)
    out, attn = jax.block_until_ready((out, attn))
    ref_out, ref_attn = reference(q, k, v)
    assert jnp.allclose(out, ref_out, atol=atol, rtol=rtol), "output mismatch (no mask)"
    assert jnp.allclose(attn, ref_attn, atol=atol, rtol=rtol), "attn mismatch (no mask)"

    # --- masked path ---
    out_m, attn_m = scaled_dot_product_attention(q, k, v, attn_mask)
    out_m, attn_m = jax.block_until_ready((out_m, attn_m))
    ref_out_m, ref_attn_m = reference(q, k, v, attn_mask)
    assert jnp.allclose(out_m, ref_out_m, atol=atol, rtol=rtol), "output mismatch (masked)"
    assert jnp.allclose(attn_m, ref_attn_m, atol=atol, rtol=rtol), "attn mismatch (masked)"

    # --- output-only fast path (skips the (B,Lq,Lk) attn writeback entirely) ---
    out_fast = scaled_dot_product_attention(q, k, v, attn_mask, return_attn=False)
    out_fast = jax.block_until_ready(out_fast)
    assert jnp.allclose(out_fast, ref_out_m, atol=atol, rtol=rtol), "output mismatch (out-only)"

    # --- non-divisible Lq exercises the padding path ---
    Lq2 = 100
    q2 = q[:, :Lq2]
    mask2 = attn_mask[:, :Lq2]
    out2, attn2 = scaled_dot_product_attention(q2, k, v, mask2)
    out2, attn2 = jax.block_until_ready((out2, attn2))
    ref_out2, ref_attn2 = reference(q2, k, v, mask2)
    assert out2.shape == (B, Lq2, D) and attn2.shape == (B, Lq2, Lk)
    assert jnp.allclose(out2, ref_out2, atol=atol, rtol=rtol), "output mismatch (padded Lq)"
    assert jnp.allclose(attn2, ref_attn2, atol=atol, rtol=rtol), "attn mismatch (padded Lq)"

    print("KERNEL_OK")
</pallas_src>

<mosaic_0001>
module attributes {stable_mosaic.version = 11 : i64} {
  func.func @_sdpa_kernel(%arg0: i32, %arg1: i32, %arg2: memref<1x128x128xf32, #tpu.memory_space<vmem>>, %arg3: memref<1x128x128xf32, #tpu.memory_space<vmem>>, %arg4: memref<1x128x128xf32, #tpu.memory_space<vmem>>, %arg5: memref<1x128x128xf32, #tpu.memory_space<vmem>>, %arg6: memref<1x128x128xf32, #tpu.memory_space<vmem>>) attributes {dimension_semantics = [#tpu.dimension_semantics<parallel>, #tpu.dimension_semantics<parallel>], iteration_bounds = array<i64: 2, 1>, scalar_prefetch = 0 : i64, scratch_operands = 0 : i64, tpu.core_type = #tpu.core_type<tc>, window_params = [{transform_indices = @transform_0, window_bounds = array<i64: 1, 128, 128>}, {transform_indices = @transform_1, window_bounds = array<i64: 1, 128, 128>}, {transform_indices = @transform_2, window_bounds = array<i64: 1, 128, 128>}, {transform_indices = @transform_3, window_bounds = array<i64: 1, 128, 128>}, {transform_indices = @transform_4, window_bounds = array<i64: 1, 128, 128>}]} {
    %c0 = arith.constant 0 : index
    %c0_0 = arith.constant 0 : index
    %c0_1 = arith.constant 0 : index
    %0 = vector.load %arg2[%c0, %c0_0, %c0_1] : memref<1x128x128xf32, #tpu.memory_space<vmem>>, vector<1x128x128xf32>
    %1 = vector.shape_cast %0 : vector<1x128x128xf32> to vector<128x128xf32>
    %c0_2 = arith.constant 0 : index
    %c0_3 = arith.constant 0 : index
    %c0_4 = arith.constant 0 : index
    %2 = vector.load %arg3[%c0_2, %c0_3, %c0_4] : memref<1x128x128xf32, #tpu.memory_space<vmem>>, vector<1x128x128xf32>
    %3 = vector.shape_cast %2 : vector<1x128x128xf32> to vector<128x128xf32>
    %c0_5 = arith.constant 0 : index
    %c0_6 = arith.constant 0 : index
    %c0_7 = arith.constant 0 : index
    %4 = vector.load %arg4[%c0_5, %c0_6, %c0_7] : memref<1x128x128xf32, #tpu.memory_space<vmem>>, vector<1x128x128xf32>
    %5 = vector.shape_cast %4 : vector<1x128x128xf32> to vector<128x128xf32>
    %cst = arith.constant 0.0883883461 : f32
    %6 = vector.broadcast %cst : f32 to vector<128x128xf32>
    %7 = arith.mulf %1, %6 : vector<128x128xf32>
    %8 = arith.truncf %7 : vector<128x128xf32> to vector<128x128xbf16>
    %9 = arith.truncf %3 : vector<128x128xf32> to vector<128x128xbf16>
    %cst_8 = arith.constant dense<0.000000e+00> : vector<128x128xf32>
    %10 = tpu.matmul %8, %9, %cst_8 {dimension_numbers = #tpu.dot_dimension_numbers<[1], [1], [0], [0], [0, 0, 1, 0], [], []>} : vector<128x128xbf16>, vector<128x128xbf16>, vector<128x128xf32> -> vector<128x128xf32>
    %cst_9 = arith.constant dense<0xFF800000> : vector<128xf32>
    %11 = vector.multi_reduction <maximumf>, %10, %cst_9 [1] : vector<128x128xf32> to vector<128xf32>
    %12 = vector.shape_cast %11 : vector<128xf32> to vector<128x1xf32>
    %13 = vector.broadcast %12 : vector<128x1xf32> to vector<128x128xf32>
    %14 = arith.subf %10, %13 : vector<128x128xf32>
    %15 = math.exp %14 : vector<128x128xf32>
    %cst_10 = arith.constant dense<0.000000e+00> : vector<128xf32>
    %16 = vector.multi_reduction <add>, %15, %cst_10 [1] : vector<128x128xf32> to vector<128xf32>
    %17 = vector.shape_cast %16 : vector<128xf32> to vector<128x1xf32>
    %18 = tpu.reciprocal %17 : vector<128x1xf32> -> vector<128x1xf32>
    %19 = vector.broadcast %18 : vector<128x1xf32> to vector<128x128xf32>
    %20 = arith.mulf %15, %19 : vector<128x128xf32>
    %21 = arith.truncf %20 : vector<128x128xf32> to vector<128x128xbf16>
    %22 = arith.truncf %5 : vector<128x128xf32> to vector<128x128xbf16>
    %cst_11 = arith.constant dense<0.000000e+00> : vector<128x128xf32>
    %23 = tpu.matmul %21, %22, %cst_11 {dimension_numbers = #tpu.dot_dimension_numbers<[1], [0], [0], [1], [0, 0, 1, 1], [], []>} : vector<128x128xbf16>, vector<128x128xbf16>, vector<128x128xf32> -> vector<128x128xf32>
    %c0_12 = arith.constant 0 : index
    %c0_13 = arith.constant 0 : index
    %c0_14 = arith.constant 0 : index
    %24 = vector.load %arg5[%c0_12, %c0_13, %c0_14] : memref<1x128x128xf32, #tpu.memory_space<vmem>>, vector<1x128x128xf32>
    %25 = vector.shape_cast %24 : vector<1x128x128xf32> to vector<128x128xf32>
    %26 = vector.shape_cast %23 : vector<128x128xf32> to vector<1x128x128xf32>
    tpu.vector_store %arg5[%c0_12, %c0_13, %c0_14], %26 {strides = array<i32>} : memref<1x128x128xf32, #tpu.memory_space<vmem>>, vector<1x128x128xf32>,
    %c0_15 = arith.constant 0 : index
    %c0_16 = arith.constant 0 : index
    %c0_17 = arith.constant 0 : index
    %27 = vector.load %arg6[%c0_15, %c0_16, %c0_17] : memref<1x128x128xf32, #tpu.memory_space<vmem>>, vector<1x128x128xf32>
    %28 = vector.shape_cast %27 : vector<1x128x128xf32> to vector<128x128xf32>
    %29 = vector.shape_cast %20 : vector<128x128xf32> to vector<1x128x128xf32>
    tpu.vector_store %arg6[%c0_15, %c0_16, %c0_17], %29 {strides = array<i32>} : memref<1x128x128xf32, #tpu.memory_space<vmem>>, vector<1x128x128xf32>,
    return
  }
  func.func @transform_0(%arg0: i32, %arg1: i32) -> (i32, i32, i32) {
    %c0_i32 = arith.constant 0 : i32
    %c0_i32_0 = arith.constant 0 : i32
    return %arg0, %arg1, %c0_i32 : i32, i32, i32
  }
  func.func @transform_1(%arg0: i32, %arg1: i32) -> (i32, i32, i32) {
    %c0_i32 = arith.constant 0 : i32
    %c0_i32_0 = arith.constant 0 : i32
    %c0_i32_1 = arith.constant 0 : i32
    return %arg0, %c0_i32, %c0_i32_0 : i32, i32, i32
  }
  func.func @transform_2(%arg0: i32, %arg1: i32) -> (i32, i32, i32) {
    %c0_i32 = arith.constant 0 : i32
    %c0_i32_0 = arith.constant 0 : i32
    %c0_i32_1 = arith.constant 0 : i32
    return %arg0, %c0_i32, %c0_i32_0 : i32, i32, i32
  }
  func.func @transform_3(%arg0: i32, %arg1: i32) -> (i32, i32, i32) {
    %c0_i32 = arith.constant 0 : i32
    %c0_i32_0 = arith.constant 0 : i32
    return %arg0, %arg1, %c0_i32 : i32, i32, i32
  }
  func.func @transform_4(%arg0: i32, %arg1: i32) -> (i32, i32, i32) {
    %c0_i32 = arith.constant 0 : i32
    %c0_i32_0 = arith.constant 0 : i32
    return %arg0, %arg1, %c0_i32 : i32, i32, i32
  }
}

</mosaic_0001>

<bundles_post_ra>
// kernel: tpu_custom_call.1
= control target key start
LH: loop header
LB: loop body
LE: loop exit
PB: predicated region body
PF: predicated region fallthrough
CT: control target
= control target key end

     0   :  { %s2037_s0 = inlined_call_operand.hbm [shape: f32[2,128,128], index: 0, kind: input, shape index: {}]   ;;  %s2038_s1 = inlined_call_operand.hbm [shape: f32[2,128,128], index: 1, kind: input, shape index: {}]   ;;  %s2039_s2 = inlined_call_operand.hbm [shape: f32[2,128,128], index: 2, kind: input, shape index: {}]   ;;  %s2040_s3 = inlined_call_operand.hbm [shape: f32[2,128,128], index: 3, kind: output, shape index: {0}]   ;;  %s2041_s4 = inlined_call_operand.hbm [shape: f32[2,128,128], index: 4, kind: output, shape index: {1}]  }
   0x1   :  { %2053 = sst [smem:[#allocation19_spill]] %s2038_s1 }
   0x2   :  { %10 = vsyncpa [#allocation3], 0 }
   0x3   :  { %12 = vsyncpa [#allocation3 + $0x1], 0 }
   0x4   :  { %13 = vsyncpa [#allocation6], 0 }
   0x5   :  { %15 = vsyncpa [#allocation6 + $0x1], 0 }
   0x6   :  { %16 = vsyncpa [#allocation4], 0 }
   0x7   :  { %18 = vsyncpa [#allocation4 + $0x1], 0 }
   0x8   :  { %19 = vsyncpa [#allocation10], 0 }
   0x9   :  { %21 = vsyncpa [#allocation10 + $0x1], 0  ;;  %s1515_s15 = smov 0   ;;  %s1517_s16 = smov 0  }
   0xa   :  { %s1519_s17 = smov 0   ;;  %s1521_s18 = smov 0  }
   0xb   :  { %s1523_s19 = smov 0   ;;  %s1525_s20 = smov 0  }
   0xc LB: > { %2054 = sst [smem:[#allocation15_spill]] %s1475_s19  ;;  %s1546_s21 = sadd.s32 4294967295, %s1479_s20   ;;  %s1479_s20 = sphi %s1525_s20, %s27_s20   ;;  %s1475_s19 = sphi %s1523_s19, %s2079_s19   ;;  %s1471_s18 = sphi %s1521_s18, %s2078_s18   ;;  %s1467_s17 = sphi %s1519_s17, %s2082_s17   ;;  %s1463_s16 = sphi %s1517_s16, %s2081_s16   ;;  %s1459_s15 = sphi %s1515_s15, %s2080_s15  }
   0xd   : > { %2055 = sst [smem:[#allocation16_spill]] %s1479_s20  ;;  %s999_s22 = sadd.s32 4294967294, %s1479_s20  }
   0xe   : > { %s39_s23 = sadd.s32 1, %s1475_s19  ;;  %s48_s24 = sadd.s32 1, %s1467_s17 }
   0xf   : > { %p41_p0 = scmp.ge.s32.totalorder %s39_s23, 2  ;;  %p55_p1 = scmp.ne.s32.totalorder %s1467_s17, %s1463_s16 }
  0x10   : > { %p56_p2 = scmp.eq.s32.totalorder %s1479_s20, 0  ;;  %p61_p3 = scmp.ne.s32.totalorder %s1463_s16, %s1459_s15 }
  0x11   : > { %s2084_s23 = smov (%p41_p0, %s39_s23), 0  ;;  %p62_p5 = scmp.eq.s32.totalorder %s1546_s21, 0 }
  0x12   : > { %2056 = sst [smem:[#allocation17_spill]] %s2084_s23  ;;  %p1558_p4 = por %p56_p2, %p55_p1 }
  0x13   : > { %s43_s26 = ssub.s32 %s1475_s19, %s2084_s23  ;;  %p139_p6 = scmp.eq.s32.totalorder %s1546_s21, 1 }
  0x14   : > { %p46_p7 = scmp.eq.s32.totalorder %s43_s26, 0  ;;  %p1566_p8 = por %p62_p5, %p61_p3 }
  0x15   : > { %p1570_p9 = por %p139_p6, %p55_p1  ;;  %p145_p10 = scmp.eq.s32.totalorder %s999_s22, 1 }
  0x16   : > { %s2058_s27 = scalar_select %p1566_p8, 1, 0 }
  0x17   : > { %s2059_s28 = scalar_select %p1570_p9, 1, 0 }
  0x18   : > { %s1575_s29 = scalar_select %p46_p7, %s1467_s17, %s48_s24  }
  0x19   : > { %p1577_p11 = por %p145_p10, %p61_p3  ;;  %p1153_p13 = scmp.lt.s32.totalorder %s1479_s20, 2 }
  0x1a   : > { %2060 = sst [smem:[#allocation18_spill]] %s1575_s29  ;;  %s2042_s5 = sand.u32 1, %s1467_s17  }
  0x1b   : > { %s2061_s30 = scalar_select %p1577_p11, 1, 0 }
  0x1c   : > { %s1586_s6 = sshll.u32 %s2042_s5, 7  ;;  %s1589_s7 = sshll.u32 %s1475_s19, 11 }
  0x1d   : > { %p1593_p0 = pnand %p1153_p13, %p1558_p4  ;;  %s216_s9 = sand.u32 1, %s1479_s20  }
  0x1e   : > { %s2063_s1 = sld [smem:[#allocation19_spill]]  ;;  %s220_s13 = scalar_lea.vmem [#allocation5], %s1586_s6 }
  0x1f   : > { %s227_s14 = sshll.u32 %s220_s13, 4  ;;  %s1609_s22 = scalar_lea.sflag [#allocation6], %s216_s9  ;;  %s1606_s14 = int_to_ptr.vmem [resolvable:$true] %s227_s14 }
  0x20   : > { %p1615_p4 = pneg %p1593_p0 }
  0x24   : > { %s1602_s12 = scalar_lea.hbm %s2063_s1, %s1589_s7  ;;  %s1276_s11 = scalar_lea.hbm %s2063_s1, 4096 }
  0x25   : > { %s1271_s24 = scalar_lea.hbm %s1602_s12, 2048  ;;  %p1277_p7 = scmp.lt.u32.totalorder %s1602_s12, %s2063_s1 }
  0x26   : > { %p1272_p3 = scmp.ne.s32.totalorder %s1602_s12, %s1271_s24  ;;  %p1278_p10 = scmp.lt.u32.totalorder %s1276_s11, %s1271_s24 }
  0x27   : > { %p1280_p12 = scmp.lt.u32.totalorder %s1271_s24, %s1602_s12 }
  0x28   : > { %p1274_p5 = pnand %p1615_p4, %p1272_p3  ;;  %p1279_p13 = por %p1278_p10, %p1277_p7 }
  0x2a   : > { %p1275_p6 = pneg %p1274_p5  ;;  %p1281_p1 = por %p1280_p12, %p1279_p13 }
  0x2c   : > { %p1282_p2 = pnand %p1281_p1, %p1275_p6 }
  0x2e   : > { %1285 = shalt.err (!%p1282_p2)
}
  0x2f   : > { %s1286_s9 = scalar_lea.vmem %s1606_s14, 2048  ;;  %s1481_s26 = smov [#allocation5]  }
  0x30   : > { %p1287_p3 = scmp.ne.s32.totalorder %s1606_s14, %s1286_s9  ;;  %s1291_s10 = sshll.u32 %s1481_s26, 4  ;;  %s1292_s10 = int_to_ptr.vmem [resolvable:$false] %s1291_s10 }
  0x31   : > { %s1293_s5 = scalar_lea.vmem %s1292_s10, 4096  ;;  %p1294_p9 = scmp.lt.s32.totalorder %s1606_s14, %s1292_s10 }
  0x32   : > { %p1289_p5 = pnand %p1287_p3, %p1615_p4  ;;  %p1295_p8 = scmp.lt.s32.totalorder %s1293_s5, %s1286_s9 }
  0x34   : > { %p1290_p11 = pneg %p1289_p5  ;;  %p1296_p7 = por %p1295_p8, %p1294_p9 }
  0x36   : > { %p1297_p10 = pnand %p1296_p7, %p1290_p11 }
  0x38   : > { %1300 = shalt.err (!%p1297_p10)
}
  0x39   : > { %s2045_s24 = smov 128   ;;  %s2047_s11 = smov 8  }
  0x3a   : > { %1142 = dma.hbm_to_vmem [thread:$0]  (!%p1593_p0), %s1602_s12, 2048, %s1606_s14, %s1609_s22, %s2045_s24, %s2045_s24, %s2047_s11  }
  0x3b   : > { %p2065_p8 = scmp.lt.s32.totalorder %s1479_s20, 3  ;;  %p2066_p9 = scmp.ge.s32.totalorder %s1479_s20, 1 }
  0x3c   : > { %s1654_s10 = scalar_lea.hbm %s2037_s0, %s1589_s7  ;;  %s197_s5 = scalar_lea.vmem [#allocation2], %s1586_s6 }
  0x3d   : > { %p1646_p11 = pnand %p2066_p9, %p2065_p8  ;;  %s206_s1 = sshll.u32 %s197_s5, 4  ;;  %s1657_s1 = int_to_ptr.vmem [resolvable:$true] %s206_s1 }
  0x3e   : > { %s1663_s24 = scalar_lea.hbm %s2039_s2, %s1589_s7  ;;  %s2068_s11 = sand.u32 1, %s1467_s17  }
  0x3f   : > { %s2067_s13 = scalar_select %p1646_p11, 1, 0 }
  0x40   : > { %s1667_s23 = scalar_lea.sflag [#allocation3], %s2068_s11  ;;  %s1301_s19 = scalar_lea.hbm %s1654_s10, 2048 }
  0x41   : > { %p1302_p12 = scmp.ne.s32.totalorder %s1654_s10, %s1301_s19  ;;  %s1306_s29 = scalar_lea.hbm %s2037_s0, 4096 }
  0x42   : > { %p1307_p6 = scmp.lt.u32.totalorder %s1654_s10, %s2037_s0  ;;  %p1308_p13 = scmp.lt.u32.totalorder %s1306_s29, %s1301_s19 }
  0x43   : > { %p1304_p1 = pnand %p1302_p12, %p1615_p4  ;;  %p1310_p5 = scmp.lt.u32.totalorder %s1301_s19, %s1654_s10 }
  0x44   : > { %p1309_p3 = por %p1308_p13, %p1307_p6 }
  0x45   : > { %p1305_p2 = pneg %p1304_p1 }
  0x46   : > { %p1311_p7 = por %p1310_p5, %p1309_p3 }
  0x48   : > { %p1312_p10 = pnand %p1311_p7, %p1305_p2 }
  0x4a   : > { %1315 = shalt.err (!%p1312_p10)
}
  0x4b   : > { %s1316_s7 = scalar_lea.vmem %s1657_s1, 2048  ;;  %s1484_s11 = smov [#allocation2]  }
  0x4c   : > { %p1317_p8 = scmp.ne.s32.totalorder %s1657_s1, %s1316_s7  ;;  %s1321_s12 = sshll.u32 %s1484_s11, 4  ;;  %s1322_s12 = int_to_ptr.vmem [resolvable:$false] %s1321_s12 }
  0x4d   : > { %s1323_s20 = scalar_lea.vmem %s1322_s12, 4096  ;;  %p1324_p1 = scmp.lt.s32.totalorder %s1657_s1, %s1322_s12 }
  0x4e   : > { %p1319_p9 = pnand %p1317_p8, %p1615_p4  ;;  %p1325_p11 = scmp.lt.s32.totalorder %s1323_s20, %s1316_s7 }
  0x50   : > { %p1320_p12 = pneg %p1319_p9  ;;  %p1326_p6 = por %p1325_p11, %p1324_p1 }
  0x52   : > { %p1327_p13 = pnand %p1326_p6, %p1320_p12 }
  0x54   : > { %1330 = shalt.err (!%p1327_p13)
}
  0x55   : > { %s2069_s19 = smov 8   ;;  %s2070_s29 = smov 128  }
  0x56   : > { %1139 = dma.hbm_to_vmem [thread:$0]  (!%p1593_p0), %s1654_s10, 2048, %s1657_s1, %s1667_s23, %s2070_s29, %s2070_s29, %s2069_s19  }
  0x57   : > { %s241_s14 = scalar_lea.vmem [#allocation7], %s1586_s6  ;;  %s1331_s26 = scalar_lea.hbm %s1663_s24, 2048 }
  0x58   : > { %s248_s9 = sshll.u32 %s241_s14, 4  ;;  %p1332_p11 = scmp.ne.s32.totalorder %s1663_s24, %s1331_s26  ;;  %s1695_s9 = int_to_ptr.vmem [resolvable:$true] %s248_s9 }
  0x59   : > { %s1336_s11 = scalar_lea.hbm %s2039_s2, 4096  ;;  %p1337_p5 = scmp.lt.u32.totalorder %s1663_s24, %s2039_s2 }
  0x5a   : > { %p1334_p2 = pnand %p1332_p11, %p1615_p4  ;;  %p1338_p7 = scmp.lt.u32.totalorder %s1336_s11, %s1331_s26 }
  0x5b   : > { %p1340_p8 = scmp.lt.u32.totalorder %s1331_s26, %s1663_s24 }
  0x5c   : > { %p1335_p3 = pneg %p1334_p2  ;;  %p1339_p10 = por %p1338_p7, %p1337_p5 }
  0x5e   : > { %p1341_p9 = por %p1340_p8, %p1339_p10 }
  0x60   : > { %p1342_p12 = pnand %p1341_p9, %p1335_p3 }
  0x62   : > { %1345 = shalt.err (!%p1342_p12)
}
  0x63   : > { %s1346_s1 = scalar_lea.vmem %s1695_s9, 2048  ;;  %s1485_s23 = smov [#allocation7]  }
  0x64   : > { %p1347_p1 = scmp.ne.s32.totalorder %s1695_s9, %s1346_s1  ;;  %s1351_s6 = sshll.u32 %s1485_s23, 4  ;;  %s1352_s6 = int_to_ptr.vmem [resolvable:$false] %s1351_s6 }
  0x65   : > { %s1353_s10 = scalar_lea.vmem %s1352_s6, 4096  ;;  %p1354_p11 = scmp.lt.s32.totalorder %s1695_s9, %s1352_s6 }
  0x66   : > { %p1349_p6 = pnand %p1347_p1, %p1615_p4  ;;  %p1355_p2 = scmp.lt.s32.totalorder %s1353_s10, %s1346_s1 }
  0x68   : > { %p1350_p13 = pneg %p1349_p6  ;;  %p1356_p5 = por %p1355_p2, %p1354_p11 }
  0x6a   : > { %p1357_p7 = pnand %p1356_p5, %p1350_p13 }
  0x6c   : > { %1360 = shalt.err (!%p1357_p7)
}
  0x6d   : > { %1145 = dma.hbm_to_vmem [thread:$0]  (!%p1593_p0), %s1663_s24, 2048, %s1695_s9, %s1609_s22, %s2070_s29, %s2070_s29, %s2069_s19  }
  0x6e   : > { %p2071_p4 = scmp.ne.s32.totalorder %s2067_s13, 0 }
  0x6f   : > { %s1725_s25 = sand.u32 (!%p2071_p4), 1, %s1463_s16   ;;  %p2072_p3 = scmp.ne.s32.totalorder (!%p2071_p4), %s2058_s27, 0 }
  0x70   : > { %260 = sbr.rel (%p2071_p4) target bundleno = 979 (0x3d3), region = 32  ;;  %s1728_s14 = sshll.u32 (!%p2071_p4), %s1725_s25, 7 }
  0x71   : > { %s263_s8 = scalar_lea.sflag (!%p2071_p4), [#allocation3], %s1725_s25  ;;  %s1732_s26 = scalar_lea.vmem (!%p2071_p4), [#allocation2], %s1728_s14 }
  0x77   : > { %1442 = dma.done.wait (%p2072_p3), %s263_s8, 2048  }
  0x78   : > { %1444 = vsyncadd (%p2072_p3), %s263_s8, 4294965248  ;;  %s271_s22 = sand.u32 1, %s1546_s21   ;;  %s1740_s13 = scalar_lea.vmem [#allocation5], %s1728_s14 }
  0x79   : > { %s272_s24 = scalar_lea.sflag [#allocation6], %s271_s22 }
  0x7a   : > { %1446 = dma.done.wait (%p2072_p3), %s272_s24, 4096  }
  0x7b   : > { %1448 = vsyncadd (%p2072_p3), %s272_s24, 4294963200  ;;  %v344_v0 = vld [vmem:[%s1740_s13] sm:$0xff]  ;;  %v345_v1 = vld [vmem:[%s1740_s13 + $0x8] sm:$0xff]  ;;  %s1809_s21 = scalar_lea.vmem [#allocation7], %s1728_s14  ;;  %s1887_s27 = scalar_lea.vmem [#allocation9], %s1728_s14 }
  0x7c   : > { %v346_v2 = vld [vmem:[%s1740_s13 + $0x10] sm:$0xff]  ;;  %v400_v3 = vpack.c.bf16 %v345_v1, %v344_v0  ;;  %v347_v4 = vld [vmem:[%s1740_s13 + $0x18] sm:$0xff]  ;;  %v328_v6 = vld [vmem:[%s1732_s26] sm:$0xff]  ;;  %s1028_s19 = sshll.u32 %s1471_s18, 11  ;;  %s833_s7 = sshll.u32 %s1887_s27, 4  ;;  %s1929_s7 = int_to_ptr.vmem [resolvable:$true] %s833_s7 }
  0x7d   : > { %v401_v5 = vpack.c.bf16 %v347_v4, %v346_v2  ;;  %v329_v7 = vld [vmem:[%s1732_s26 + $0x8] sm:$0xff]  ;;  %v348_v8 = vld [vmem:[%s1740_s13 + $0x20] sm:$0xff]  ;;  %v376_v10 = vmul.f32 0.088388346, %v328_v6  ;;  %v350_v14 = vld [vmem:[%s1740_s13 + $0x30] sm:$0xff]  ;;  %s1926_s5 = scalar_lea.hbm %s2041_s4, %s1028_s19  ;;  %s800_s11 = scalar_lea.sflag [#allocation10], %s1725_s25 }
  0x7e   : > { %1062 = vmatprep.subr.bf16.mxu0 %v400_v3  ;;  %v349_v9 = vld [vmem:[%s1740_s13 + $0x28] sm:$0xff]  ;;  %v377_v11 = vmul.f32 0.088388346, %v329_v7  ;;  %v351_v15 = vld [vmem:[%s1740_s13 + $0x38] sm:$0xff]  ;;  %v352_v17 = vld [vmem:[%s1740_s13 + $0x40] sm:$0xff]  ;;  %s1361_s12 = scalar_lea.vmem %s1929_s7, 2048 }
  0x7f   : > { %1063 = vmatpush3.bf16.xpose.msra.mxu0 %v400_v3  ;;  %v402_v13 = vpack.c.bf16 %v349_v9, %v348_v8  ;;  %v403_v16 = vpack.c.bf16 %v351_v15, %v350_v14  ;;  %v353_v18 = vld [vmem:[%s1740_s13 + $0x48] sm:$0xff]  ;;  %v354_v20 = vld [vmem:[%s1740_s13 + $0x50] sm:$0xff]  ;;  %v355_v21 = vld [vmem:[%s1740_s13 + $0x58] sm:$0xff]  ;;  %p1362_p0 = scmp.ne.s32.totalorder %s1929_s7, %s1361_s12  ;;  %p2073_p10 = scmp.ne.s32.totalorder %s2059_s28, 0 }
  0x80   : > { %1064 = vmatprep.subr.bf16.mxu0 %v401_v5  ;;  %v392_v12 = vpack.c.bf16 %v377_v11, %v376_v10  ;;  %v404_v19 = vpack.c.bf16 %v353_v18, %v352_v17  ;;  %v405_v22 = vpack.c.bf16 %v355_v21, %v354_v20  ;;  %v356_v23 = vld [vmem:[%s1740_s13 + $0x60] sm:$0xff]  ;;  %v357_v24 = vld [vmem:[%s1740_s13 + $0x68] sm:$0xff]  ;;  %v358_v26 = vld [vmem:[%s1740_s13 + $0x70] sm:$0xff]  ;;  %s1486_s20 = smov [#allocation9]  }
  0x81   : > { %v406_v25 = vpack.c.bf16 %v357_v24, %v356_v23  ;;  %v359_v27 = vld [vmem:[%s1740_s13 + $0x78] sm:$0xff]  ;;  %v330_v29 = vld [vmem:[%s1732_s26 + $0x10] sm:$0xff]  ;;  %v332_v31 = vld [vmem:[%s1732_s26 + $0x20] sm:$0xff]  ;;  %p1363_p8 = pnand %p1362_p0, %p2073_p10  ;;  %s1365_s1 = sshll.u32 %s1486_s20, 4  ;;  %s1366_s1 = int_to_ptr.vmem [resolvable:$false] %s1365_s1 }
  0x82   : > { %1078 = vmatprep.mubr.bf16.mxu0 %v392_v12  ;;  %v407_v28 = vpack.c.bf16 %v359_v27, %v358_v26  ;;  %v331_v30 = vld [vmem:[%s1732_s26 + $0x18] sm:$0xff]  ;;  %v333_v32 = vld [vmem:[%s1732_s26 + $0x28] sm:$0xff]  ;;  %v378_v33 = vmul.f32 0.088388346, %v330_v29  ;;  %v380_v35 = vmul.f32 0.088388346, %v332_v31  ;;  %p1368_p12 = scmp.lt.s32.totalorder %s1929_s7, %s1366_s1 }
  0x83   : > { %v379_v34 = vmul.f32 0.088388346, %v331_v30  ;;  %v381_v36 = vmul.f32 0.088388346, %v333_v32  ;;  %v334_v39 = vld [vmem:[%s1732_s26 + $0x30] sm:$0xff]  ;;  %v335_v40 = vld [vmem:[%s1732_s26 + $0x38] sm:$0xff]  ;;  %p1364_p9 = pneg %p1363_p8 }
  0x84   : > { %v336_v41 = vld [vmem:[%s1732_s26 + $0x40] sm:$0xff]  ;;  %v337_v42 = vld [vmem:[%s1732_s26 + $0x48] sm:$0xff]  ;;  %v382_v43 = vmul.f32 0.088388346, %v334_v39  ;;  %v383_v44 = vmul.f32 0.088388346, %v335_v40 }
  0x85   : > { %v393_v37 = vpack.c.bf16 %v379_v34, %v378_v33  ;;  %v394_v38 = vpack.c.bf16 %v381_v36, %v380_v35  ;;  %v384_v45 = vmul.f32 0.088388346, %v336_v41  ;;  %v385_v46 = vmul.f32 0.088388346, %v337_v42  ;;  %v338_v49 = vld [vmem:[%s1732_s26 + $0x50] sm:$0xff]  ;;  %v339_v50 = vld [vmem:[%s1732_s26 + $0x58] sm:$0xff] }
  0x86   : > { %v395_v47 = vpack.c.bf16 %v383_v44, %v382_v43  ;;  %v340_v51 = vld [vmem:[%s1732_s26 + $0x60] sm:$0xff]  ;;  %v341_v52 = vld [vmem:[%s1732_s26 + $0x68] sm:$0xff]  ;;  %v386_v53 = vmul.f32 0.088388346, %v338_v49  ;;  %v387_v54 = vmul.f32 0.088388346, %v339_v50 }
  0x87   : > { %1065 = vmatpush3.bf16.xpose.msra.mxu0 %v401_v5  ;;  %v396_v48 = vpack.c.bf16 %v385_v46, %v384_v45  ;;  %v388_v55 = vmul.f32 0.088388346, %v340_v51  ;;  %v389_v56 = vmul.f32 0.088388346, %v341_v52  ;;  %v342_v59 = vld [vmem:[%s1732_s26 + $0x70] sm:$0xff]  ;;  %v343_v60 = vld [vmem:[%s1732_s26 + $0x78] sm:$0xff] }
  0x88   : > { %1066 = vmatprep.subr.bf16.mxu0 %v402_v13  ;;  %v397_v57 = vpack.c.bf16 %v387_v54, %v386_v53  ;;  %v390_v61 = vmul.f32 0.088388346, %v342_v59  ;;  %v391_v62 = vmul.f32 0.088388346, %v343_v60  ;;  %v361_v17 = vld [vmem:[%s1809_s21 + $0x8] sm:$0xff]  ;;  %v362_v18 = vld [vmem:[%s1809_s21 + $0x10] sm:$0xff] }
  0x89   : > { %v398_v58 = vpack.c.bf16 %v389_v56, %v388_v55  ;;  %v363_v20 = vld [vmem:[%s1809_s21 + $0x18] sm:$0xff]  ;;  %v365_v23 = vld [vmem:[%s1809_s21 + $0x28] sm:$0xff]  ;;  %s1367_s23 = scalar_lea.vmem %s1366_s1, 4096 }
  0x8a   : > { %v399_v63 = vpack.c.bf16 %v391_v62, %v390_v61  ;;  %v658_v21 = vpack.c.bf16 %v363_v20, %v362_v18  ;;  %v367_v18 = vld [vmem:[%s1809_s21 + $0x38] sm:$0xff]  ;;  %p1369_p1 = scmp.lt.s32.totalorder %s1367_s23, %s1361_s12 }
  0x8c   : > { %p1370_p6 = por %p1369_p1, %p1368_p12 }
  0x8e   : > { %p1371_p13 = pnand %p1370_p6, %p1364_p9 }
  0x8f   : > { %1067 = vmatpush3.bf16.xpose.msra.mxu0 %v402_v13 }
  0x90   : > { %1068 = vmatprep.subr.bf16.mxu0 %v403_v16 }
  0x97   : > { %1069 = vmatpush3.bf16.xpose.msra.mxu0 %v403_v16  ;;  %v360_v16 = vld [vmem:[%s1809_s21] sm:$0xff] }
  0x98   : > { %1070 = vmatprep.subr.bf16.mxu0 %v404_v19 }
  0x9f   : > { %1071 = vmatpush3.bf16.xpose.msra.mxu0 %v404_v19  ;;  %v657_v19 = vpack.c.bf16 %v361_v17, %v360_v16  ;;  %v366_v17 = vld [vmem:[%s1809_s21 + $0x30] sm:$0xff] }
  0xa0   : > { %1072 = vmatprep.subr.bf16.mxu0 %v405_v22 }
  0xa1   : > { %1094 = vmatprep.subr.bf16.mxu1 %v657_v19 }
  0xa2   : > { %1095 = vmatpush3.bf16.msra.mxu1 %v657_v19 }
  0xa3   : > { %1096 = vmatprep.subr.bf16.mxu1 %v658_v21 }
  0xa6   : > { %1097 = vmatpush3.bf16.msra.mxu1 %v658_v21  ;;  %v660_v21 = vpack.c.bf16 %v367_v18, %v366_v17 }
  0xa7   : > { %1073 = vmatpush3.bf16.xpose.msra.mxu0 %v405_v22  ;;  %v364_v22 = vld [vmem:[%s1809_s21 + $0x20] sm:$0xff] }
  0xa8   : > { %1074 = vmatprep.subr.bf16.mxu0 %v406_v25  ;;  %v659_v24 = vpack.c.bf16 %v365_v23, %v364_v22 }
  0xaa   : > { %1098 = vmatprep.subr.bf16.mxu1 %v659_v24 }
  0xab   : > { %1099 = vmatpush3.bf16.msra.mxu1 %v659_v24  ;;  %v368_v24 = vld [vmem:[%s1809_s21 + $0x40] sm:$0xff] }
  0xac   : > { %1100 = vmatprep.subr.bf16.mxu1 %v660_v21 }
  0xaf   : > { %1075 = vmatpush3.bf16.xpose.msra.mxu0 %v406_v25  ;;  %1101 = vmatpush3.bf16.msra.mxu1 %v660_v21 }
  0xb0   : > { %1076 = vmatprep.subr.bf16.mxu0 %v407_v28 }
  0xb7   : > { %1077 = vmatpush3.bf16.xpose.msra.mxu0 %v407_v28 }
  0xbe   : > { %1079 = vmatmul.mubr.bf16.vlgmr.msra.gmra.mrb[0].mxu0 %v393_v37 }
  0xbf   : > { %1082 = vmatprep.mubr.bf16.mxu0 %v394_v38 }
  0xc6   : > { %1083 = vmatmul.mubr.bf16.gmra.mrb[4].mxu0 %v395_v47 }
  0xc7   : > { %1086 = vmatprep.mubr.bf16.mxu0 %v396_v48 }
  0xce   : > { %1087 = vmatmul.mubr.bf16.gmra.mrb[8].mxu0 %v397_v57 }
  0xcf   : > { %1090 = vmatprep.mubr.bf16.mxu0 %v398_v58 }
  0xd6   : > { %1091 = vmatmul.mubr.bf16.gmra.mrb[12].mxu0 %v399_v63 }
 0x191   : > { %v1080_v0 = vpop.f32.mrb[0].mxu0 }
 0x192   : > { %509 = vmax.xlane.f32.xlu1 %v1080_v0  ;;  %v442_v1 = vpop.f32.mrb[1].mxu0 }
 0x193   : > { %505 = vmax.xlane.f32.xlu0 %v442_v1  ;;  %v1081_v2 = vpop.f32.mrb[2].mxu0 }
 0x194   : > { %v445_v3 = vpop.f32.mrb[3].mxu0 }
 0x196   : > { %511 = vmax.xlane.f32.xlu1 %v1081_v2 }
 0x197   : > { %507 = vmax.xlane.f32.xlu0 %v445_v3 }
 0x199   : > { %v1778_v4 = vpop.f32.mrb[4].mxu0 }
 0x19a   : > { %v458_v5 = vpop.f32.mrb[5].mxu0 }
 0x19b   : > { %513 = vmax.xlane.f32.xlu0 %v458_v5  ;;  %v1780_v6 = vpop.f32.mrb[6].mxu0 }
 0x19c   : > { %v461_v7 = vpop.f32.mrb[7].mxu0 }
 0x19d   : > { %515 = vmax.xlane.f32.xlu1 %v461_v7 }
 0x19f   : > { %517 = vmax.xlane.f32.xlu0 %v1778_v4 }
 0x1a1   : > { %519 = vmax.xlane.f32.xlu1 %v1780_v6  ;;  %v1784_v8 = vpop.f32.mrb[8].mxu0 }
 0x1a2   : > { %v1786_v9 = vpop.f32.mrb[9].mxu0 }
 0x1a3   : > { %521 = vmax.xlane.f32.xlu0 %v1786_v9  ;;  %v1789_v10 = vpop.f32.mrb[10].mxu0 }
 0x1a4   : > { %v1791_v11 = vpop.f32.mrb[11].mxu0 }
 0x1a5   : > { %523 = vmax.xlane.f32.xlu1 %v1791_v11 }
 0x1a7   : > { %525 = vmax.xlane.f32.xlu0 %v1784_v8 }
 0x1a9   : > { %527 = vmax.xlane.f32.xlu1 %v1789_v10  ;;  %v1796_v12 = vpop.f32.mrb[12].mxu0 }
 0x1aa   : > { %v1798_v13 = vpop.f32.mrb[13].mxu0 }
 0x1ab   : > { %529 = vmax.xlane.f32.xlu0 %v1798_v13  ;;  %v1801_v14 = vpop.f32.mrb[14].mxu0 }
 0x1ac   : > { %v1803_v15 = vpop.f32.mrb[15].mxu0 }
 0x1ad   : > { %531 = vmax.xlane.f32.xlu1 %v1803_v15 }
 0x1af   : > { %533 = vmax.xlane.f32.xlu0 %v1796_v12 }
 0x1b1   : > { %535 = vmax.xlane.f32.xlu1 %v1801_v14 }
 0x21f   : > { %v510_v25 = vpop.xlane.xlu1 %509 }
 0x220   : > { %v539_v26 = vsub.f32 %v1080_v0, %v510_v25  ;;  %v506_v27 = vpop.xlane.xlu0 %505  ;;  %v369_v25 = vld [vmem:[%s1809_s21 + $0x48] sm:$0xff] }
 0x221   : > { %v537_v28 = vsub.f32 %v442_v1, %v506_v27 }
 0x222   : > { %v557_v31 = vmul.f32 1.442695, %v539_v26 }
 0x223   : > { %v553_v29 = vmul.f32 1.442695, %v537_v28  ;;  %v512_v30 = vpop.xlane.xlu1 %511  ;;  %v370_v28 = vld [vmem:[%s1809_s21 + $0x50] sm:$0xff] }
 0x224   : > { %v540_v32 = vsub.f32 %v1081_v2, %v512_v30  ;;  %v508_v33 = vpop.xlane.xlu0 %507 }
 0x225   : > { %1207 = vpow2.f32 %v553_v29  ;;  %v538_v34 = vsub.f32 %v445_v3, %v508_v33  ;;  %v371_v29 = vld [vmem:[%s1809_s21 + $0x58] sm:$0xff]  ;;  %v372_v33 = vld [vmem:[%s1809_s21 + $0x60] sm:$0xff] }
 0x226   : > { %1209 = vpow2.f32 %v557_v31  ;;  %v559_v36 = vmul.f32 1.442695, %v540_v32  ;;  %v662_v30 = vpack.c.bf16 %v371_v29, %v370_v28 }
 0x227   : > { %v555_v35 = vmul.f32 1.442695, %v538_v34  ;;  %v373_v34 = vld [vmem:[%s1809_s21 + $0x68] sm:$0xff] }
 0x228   : > { %v514_v37 = vpop.xlane.xlu0 %513 }
 0x229   : > { %1211 = vpow2.f32 %v555_v35  ;;  %v541_v38 = vsub.f32 %v458_v5, %v514_v37  ;;  %v663_v35 = vpack.c.bf16 %v373_v34, %v372_v33  ;;  %v374_v37 = vld [vmem:[%s1809_s21 + $0x70] sm:$0xff] }
 0x22a   : > { %v516_v39 = vpop.xlane.xlu1 %515  ;;  %1213 = vpow2.f32 %v559_v36 }
 0x22b   : > { %v561_v40 = vmul.f32 1.442695, %v541_v38  ;;  %v542_v41 = vsub.f32 %v461_v7, %v516_v39  ;;  %v375_v38 = vld [vmem:[%s1809_s21 + $0x78] sm:$0xff] }
 0x22c   : > { %v518_v42 = vpop.xlane.xlu0 %517  ;;  %v664_v39 = vpack.c.bf16 %v375_v38, %v374_v37 }
 0x22d   : > { %1215 = vpow2.f32 %v561_v40  ;;  %v563_v43 = vmul.f32 1.442695, %v542_v41  ;;  %v543_v44 = vsub.f32 %v1778_v4, %v518_v42 }
 0x22e   : > { %v520_v45 = vpop.xlane.xlu1 %519 }
 0x22f   : > { %v1818_v46 = vpop.eup %1207  ;;  %v565_v47 = vmul.f32 1.442695, %v543_v44  ;;  %v544_v48 = vsub.f32 %v1780_v6, %v520_v45  ;;  %1217 = vpow2.f32 %v563_v43 }
 0x230   : > { %v522_v49 = vpop.xlane.xlu0 %521  ;;  %585 = vadd.xlane.f32.xlu0 %v1818_v46  ;;  %v1823_v52 = vpop.eup %1209 }
 0x231   : > { %1219 = vpow2.f32 %v565_v47  ;;  %v567_v50 = vmul.f32 1.442695, %v544_v48  ;;  %v545_v51 = vsub.f32 %v1786_v9, %v522_v49 }
 0x232   : > { %v524_v53 = vpop.xlane.xlu1 %523 }
 0x233   : > { %v1825_v54 = vpop.eup %1211  ;;  %v569_v55 = vmul.f32 1.442695, %v545_v51  ;;  %v546_v56 = vsub.f32 %v1791_v11, %v524_v53  ;;  %1221 = vpow2.f32 %v567_v50 }
 0x234   : > { %v526_v57 = vpop.xlane.xlu0 %525  ;;  %589 = vadd.xlane.f32.xlu0 %v1823_v52  ;;  %587 = vadd.xlane.f32.xlu1 %v1825_v54  ;;  %v1831_v60 = vpop.eup %1213 }
 0x235   : > { %1223 = vpow2.f32 %v569_v55  ;;  %v571_v58 = vmul.f32 1.442695, %v546_v56  ;;  %v547_v59 = vsub.f32 %v1784_v8, %v526_v57 }
 0x236   : > { %v528_v61 = vpop.xlane.xlu1 %527 }
 0x237   : > { %v1833_v62 = vpop.eup %1215  ;;  %v573_v63 = vmul.f32 1.442695, %v547_v59  ;;  %v548_v0 = vsub.f32 %v1789_v10, %v528_v61  ;;  %1225 = vpow2.f32 %v571_v58 }
 0x238   : > { %593 = vadd.xlane.f32.xlu0 %v1833_v62  ;;  %v530_v1 = vpop.xlane.xlu0 %529  ;;  %591 = vadd.xlane.f32.xlu1 %v1831_v60 }
 0x239   : > { %1227 = vpow2.f32 %v573_v63  ;;  %v575_v2 = vmul.f32 1.442695, %v548_v0  ;;  %v549_v3 = vsub.f32 %v1798_v13, %v530_v1  ;;  %v1839_v4 = vpop.eup %1217 }
 0x23a   : > { %v532_v5 = vpop.xlane.xlu1 %531 }
 0x23b   : > { %v1841_v6 = vpop.eup %1219  ;;  %v577_v7 = vmul.f32 1.442695, %v549_v3  ;;  %v550_v8 = vsub.f32 %v1803_v15, %v532_v5  ;;  %1229 = vpow2.f32 %v575_v2 }
 0x23c   : > { %597 = vadd.xlane.f32.xlu0 %v1841_v6  ;;  %v534_v9 = vpop.xlane.xlu0 %533  ;;  %595 = vadd.xlane.f32.xlu1 %v1839_v4 }
 0x23d   : > { %1231 = vpow2.f32 %v577_v7  ;;  %v579_v10 = vmul.f32 1.442695, %v550_v8  ;;  %v551_v11 = vsub.f32 %v1796_v12, %v534_v9  ;;  %v1847_v13 = vpop.eup %1221 }
 0x23e   : > { %v536_v16 = vpop.xlane.xlu1 %535 }
 0x23f   : > { %v1851_v19 = vpop.eup %1223  ;;  %v581_v15 = vmul.f32 1.442695, %v551_v11  ;;  %v552_v20 = vsub.f32 %v1801_v14, %v536_v16  ;;  %1233 = vpow2.f32 %v579_v10  ;;  %v661_v14 = vpack.c.bf16 %v369_v25, %v368_v24 }
 0x240   : > { %601 = vadd.xlane.f32.xlu0 %v1851_v19  ;;  %599 = vadd.xlane.f32.xlu1 %v1847_v13 }
 0x241   : > { %1235 = vpow2.f32 %v581_v15  ;;  %v583_v12 = vmul.f32 1.442695, %v552_v20  ;;  %v1856_v22 = vpop.eup %1225  ;;  %1102 = vmatprep.subr.bf16.mxu1 %v661_v14 }
 0x242   : > { %1103 = vmatpush3.bf16.msra.mxu1 %v661_v14 }
 0x243   : > { %v1858_v23 = vpop.eup %1227  ;;  %1237 = vpow2.f32 %v583_v12  ;;  %1104 = vmatprep.subr.bf16.mxu1 %v662_v30 }
 0x244   : > { %605 = vadd.xlane.f32.xlu0 %v1858_v23  ;;  %603 = vadd.xlane.f32.xlu1 %v1856_v22 }
 0x245   : > { %v1864_v26 = vpop.eup %1229 }
 0x246   : > { %1105 = vmatpush3.bf16.msra.mxu1 %v662_v30 }
 0x247   : > { %v1866_v27 = vpop.eup %1231  ;;  %1106 = vmatprep.subr.bf16.mxu1 %v663_v35 }
 0x248   : > { %609 = vadd.xlane.f32.xlu0 %v1866_v27  ;;  %607 = vadd.xlane.f32.xlu1 %v1864_v26 }
 0x249   : > { %v1872_v31 = vpop.eup %1233 }
 0x24a   : > { %1107 = vmatpush3.bf16.msra.mxu1 %v663_v35 }
 0x24b   : > { %v1874_v32 = vpop.eup %1235  ;;  %1108 = vmatprep.subr.bf16.mxu1 %v664_v39 }
 0x24c   : > { %613 = vadd.xlane.f32.xlu0 %v1874_v32  ;;  %611 = vadd.xlane.f32.xlu1 %v1872_v31 }
 0x24d   : > { %v1880_v36 = vpop.eup %1237 }
 0x24e   : > { %1109 = vmatpush3.bf16.msra.mxu1 %v664_v39 }
 0x250   : > { %615 = vadd.xlane.f32.xlu1 %v1880_v36 }
 0x2bd   : > { %v586_v40 = vpop.xlane.xlu0 %585 }
 0x2be   : > { %1239 = vrcp.f32 %v586_v40 }
 0x2c1   : > { %v590_v41 = vpop.xlane.xlu0 %589  ;;  %v588_v42 = vpop.xlane.xlu1 %587 }
 0x2c2   : > { %1241 = vrcp.f32 %v590_v41 }
 0x2c3   : > { %1243 = vrcp.f32 %v588_v42 }
 0x2c5   : > { %v594_v43 = vpop.xlane.xlu0 %593  ;;  %v592_v44 = vpop.xlane.xlu1 %591 }
 0x2c6   : > { %1245 = vrcp.f32 %v594_v43 }
 0x2c7   : > { %1247 = vrcp.f32 %v592_v44 }
 0x2c8   : > { %v1240_v45 = vpop.eup %1239 }
 0x2c9   : > { %v598_v47 = vpop.xlane.xlu0 %597  ;;  %v596_v48 = vpop.xlane.xlu1 %595  ;;  %v633_v49 = vmul.f32 %v1240_v45, %v1818_v46 }
 0x2ca   : > { %1249 = vrcp.f32 %v598_v47 }
 0x2cb   : > { %1251 = vrcp.f32 %v596_v48  ;;  %778 = vst [vmem:[%s1887_s27] sm:$0xff] %v633_v49 }
 0x2cc   : > { %v1242_v50 = vpop.eup %1241 }
 0x2cd   : > { %v1244_v51 = vpop.eup %1243  ;;  %v602_v53 = vpop.xlane.xlu0 %601  ;;  %v635_v56 = vmul.f32 %v1242_v50, %v1823_v52 }
 0x2ce   : > { %v600_v55 = vpop.xlane.xlu1 %599  ;;  %1253 = vrcp.f32 %v602_v53  ;;  %v634_v57 = vmul.f32 %v1244_v51, %v1825_v54 }
 0x2cf   : > { %1255 = vrcp.f32 %v600_v55  ;;  %780 = vst [vmem:[%s1887_s27 + $0x10] sm:$0xff] %v635_v56 }
 0x2d0   : > { %v1246_v46 = vpop.eup %1245  ;;  %v649_v58 = vpack.c.bf16 %v634_v57, %v633_v49  ;;  %779 = vst [vmem:[%s1887_s27 + $0x8] sm:$0xff] %v634_v57 }
 0x2d1   : > { %v1248_v59 = vpop.eup %1247  ;;  %v606_v61 = vpop.xlane.xlu0 %605  ;;  %v637_v0 = vmul.f32 %v1246_v46, %v1833_v62 }
 0x2d2   : > { %v604_v63 = vpop.xlane.xlu1 %603  ;;  %1257 = vrcp.f32 %v606_v61  ;;  %1110 = vmatprep.mubr.bf16.mxu1 %v649_v58  ;;  %v636_v52 = vmul.f32 %v1248_v59, %v1831_v60 }
 0x2d3   : > { %1259 = vrcp.f32 %v604_v63  ;;  %782 = vst [vmem:[%s1887_s27 + $0x20] sm:$0xff] %v637_v0 }
 0x2d4   : > { %v1250_v54 = vpop.eup %1249  ;;  %v650_v1 = vpack.c.bf16 %v636_v52, %v635_v56  ;;  %781 = vst [vmem:[%s1887_s27 + $0x18] sm:$0xff] %v636_v52 }
 0x2d5   : > { %v1252_v2 = vpop.eup %1251  ;;  %v610_v3 = vpop.xlane.xlu0 %609  ;;  %v639_v7 = vmul.f32 %v1250_v54, %v1841_v6 }
 0x2d6   : > { %v608_v5 = vpop.xlane.xlu1 %607  ;;  %1261 = vrcp.f32 %v610_v3  ;;  %1111 = vmatmul.mubr.bf16.vlgmr.msra.gmra.mrb[0].mxu1 %v650_v1  ;;  %v638_v62 = vmul.f32 %v1252_v2, %v1839_v4 }
 0x2d7   : > { %1263 = vrcp.f32 %v608_v5  ;;  %784 = vst [vmem:[%s1887_s27 + $0x30] sm:$0xff] %v639_v7 }
 0x2d8   : > { %v1254_v60 = vpop.eup %1253  ;;  %v651_v8 = vpack.c.bf16 %v638_v62, %v637_v0  ;;  %783 = vst [vmem:[%s1887_s27 + $0x28] sm:$0xff] %v638_v62 }
 0x2d9   : > { %v1256_v9 = vpop.eup %1255  ;;  %v614_v10 = vpop.xlane.xlu0 %613  ;;  %v641_v16 = vmul.f32 %v1254_v60, %v1851_v19 }
 0x2da   : > { %v612_v11 = vpop.xlane.xlu1 %611  ;;  %1265 = vrcp.f32 %v614_v10  ;;  %1114 = vmatprep.mubr.bf16.mxu1 %v651_v8  ;;  %v640_v6 = vmul.f32 %v1256_v9, %v1847_v13 }
 0x2db   : > { %1267 = vrcp.f32 %v612_v11  ;;  %786 = vst [vmem:[%s1887_s27 + $0x40] sm:$0xff] %v641_v16 }
 0x2dc   : > { %v1258_v4 = vpop.eup %1257  ;;  %v652_v17 = vpack.c.bf16 %v640_v6, %v639_v7  ;;  %785 = vst [vmem:[%s1887_s27 + $0x38] sm:$0xff] %v640_v6 }
 0x2dd   : > { %v1260_v18 = vpop.eup %1259  ;;  %v643_v20 = vmul.f32 %v1258_v4, %v1858_v23 }
 0x2de   : > { %v616_v15 = vpop.xlane.xlu1 %615  ;;  %1115 = vmatmul.mubr.bf16.gmra.mrb[4].mxu1 %v652_v17  ;;  %v642_v19 = vmul.f32 %v1260_v18, %v1856_v22 }
 0x2df   : > { %1269 = vrcp.f32 %v616_v15  ;;  %788 = vst [vmem:[%s1887_s27 + $0x50] sm:$0xff] %v643_v20 }
 0x2e0   : > { %v1262_v21 = vpop.eup %1261  ;;  %v653_v12 = vpack.c.bf16 %v642_v19, %v641_v16  ;;  %787 = vst [vmem:[%s1887_s27 + $0x48] sm:$0xff] %v642_v19 }
 0x2e1   : > { %v1264_v13 = vpop.eup %1263  ;;  %v645_v24 = vmul.f32 %v1262_v21, %v1866_v27 }
 0x2e2   : > { %1118 = vmatprep.mubr.bf16.mxu1 %v653_v12  ;;  %v644_v25 = vmul.f32 %v1264_v13, %v1864_v26 }
 0x2e3   : > { %790 = vst [vmem:[%s1887_s27 + $0x60] sm:$0xff] %v645_v24 }
 0x2e4   : > { %v1266_v14 = vpop.eup %1265  ;;  %v654_v23 = vpack.c.bf16 %v644_v25, %v643_v20  ;;  %789 = vst [vmem:[%s1887_s27 + $0x58] sm:$0xff] %v644_v25 }
 0x2e5   : > { %v1268_v22 = vpop.eup %1267  ;;  %v647_v28 = vmul.f32 %v1266_v14, %v1874_v32 }
 0x2e6   : > { %1119 = vmatmul.mubr.bf16.gmra.mrb[8].mxu1 %v654_v23  ;;  %v646_v29 = vmul.f32 %v1268_v22, %v1872_v31 }
 0x2e7   : > { %792 = vst [vmem:[%s1887_s27 + $0x70] sm:$0xff] %v647_v28 }
 0x2e8   : > { %v655_v30 = vpack.c.bf16 %v646_v29, %v645_v24  ;;  %791 = vst [vmem:[%s1887_s27 + $0x68] sm:$0xff] %v646_v29 }
 0x2e9   : > { %v1270_v27 = vpop.eup %1269 }
 0x2ea   : > { %v648_v26 = vmul.f32 %v1270_v27, %v1880_v36  ;;  %1122 = vmatprep.mubr.bf16.mxu1 %v655_v30 }
 0x2ec   : > { %v656_v33 = vpack.c.bf16 %v648_v26, %v647_v28  ;;  %793 = vst [vmem:[%s1887_s27 + $0x78] sm:$0xff] %v648_v26 }
 0x2ee   : > { %1123 = vmatmul.mubr.bf16.gmra.mrb[12].mxu1 %v656_v33 }
 0x2ef   : > { %1374 = shalt.err (!%p1371_p13)
}
 0x2f0   : > { %s1375_s6 = scalar_lea.hbm %s1926_s5, 2048  ;;  %s1379_s26 = scalar_lea.hbm %s2041_s4, 4096 }
 0x2f1   : > { %p1376_p11 = scmp.ne.s32.totalorder %s1926_s5, %s1375_s6  ;;  %p1380_p7 = scmp.lt.u32.totalorder %s1926_s5, %s2041_s4 }
 0x2f2   : > { %p1381_p4 = scmp.lt.u32.totalorder %s1379_s26, %s1375_s6  ;;  %p1383_p0 = scmp.lt.u32.totalorder %s1375_s6, %s1926_s5 }
 0x2f3   : > { %p1377_p2 = pnand %p1376_p11, %p2073_p10 }
 0x2f4   : > { %p1382_p3 = por %p1381_p4, %p1380_p7 }
 0x2f5   : > { %p1378_p5 = pneg %p1377_p2 }
 0x2f6   : > { %p1384_p8 = por %p1383_p0, %p1382_p3 }
 0x2f8   : > { %p1385_p9 = pnand %p1384_p8, %p1378_p5 }
 0x2fa   : > { %1388 = shalt.err (!%p1385_p9)
}
 0x2fb   : > { %s1487_s13 = smov 128   ;;  %s1488_s21 = smov 8  }
 0x2fc   : > { %1133 = dma.vmem_to_hbm [thread:$0]  (%p2073_p10), %s1929_s7, 2048, %s1926_s5, %s800_s11, %s1487_s13, %s1487_s13, %s1488_s21  }
 0x2fd   : > { %s1959_s27 = scalar_lea.vmem [#allocation8], %s1728_s14  ;;  %s1981_s5 = scalar_lea.hbm %s2040_s3, %s1028_s19 }
 0x2fe   : > { %s815_s14 = sshll.u32 %s1959_s27, 4  ;;  %s795_s7 = scalar_lea.sflag [#allocation4], %s1725_s25  ;;  %s1983_s14 = int_to_ptr.vmem [resolvable:$true] %s815_s14 }
 0x2ff   : > { %s1389_s11 = scalar_lea.vmem %s1983_s14, 2048  ;;  %s1489_s18 = smov [#allocation8]  }
 0x300   : > { %p1390_p12 = scmp.ne.s32.totalorder %s1983_s14, %s1389_s11  ;;  %s1393_s12 = sshll.u32 %s1489_s18, 4  ;;  %s1394_s12 = int_to_ptr.vmem [resolvable:$false] %s1393_s12 }
 0x301   : > { %s1395_s20 = scalar_lea.vmem %s1394_s12, 4096  ;;  %p1396_p13 = scmp.lt.s32.totalorder %s1983_s14, %s1394_s12 }
 0x302   : > { %p1391_p1 = pnand %p1390_p12, %p2073_p10  ;;  %p1397_p11 = scmp.lt.s32.totalorder %s1395_s20, %s1389_s11 }
 0x304   : > { %p1392_p6 = pneg %p1391_p1  ;;  %p1398_p2 = por %p1397_p11, %p1396_p13 }
 0x306   : > { %p1399_p5 = pnand %p1398_p2, %p1392_p6 }
 0x3a9   : > { %v1112_v31 = vpop.f32.mrb[0].mxu1 }
 0x3aa   : > { %764 = vst [vmem:[%s1959_s27 + $0x10] sm:$0xff] %v1112_v31  ;;  %v699_v32 = vpop.f32.mrb[1].mxu1 }
 0x3ab   : > { %762 = vst [vmem:[%s1959_s27] sm:$0xff] %v699_v32  ;;  %v1113_v34 = vpop.f32.mrb[2].mxu1 }
 0x3ac   : > { %765 = vst [vmem:[%s1959_s27 + $0x18] sm:$0xff] %v1113_v34  ;;  %v702_v35 = vpop.f32.mrb[3].mxu1 }
 0x3ad   : > { %763 = vst [vmem:[%s1959_s27 + $0x8] sm:$0xff] %v702_v35 }
 0x3b1   : > { %v1116_v36 = vpop.f32.mrb[4].mxu1 }
 0x3b2   : > { %768 = vst [vmem:[%s1959_s27 + $0x30] sm:$0xff] %v1116_v36  ;;  %v715_v37 = vpop.f32.mrb[5].mxu1 }
 0x3b3   : > { %766 = vst [vmem:[%s1959_s27 + $0x20] sm:$0xff] %v715_v37  ;;  %v1117_v38 = vpop.f32.mrb[6].mxu1 }
 0x3b4   : > { %769 = vst [vmem:[%s1959_s27 + $0x38] sm:$0xff] %v1117_v38  ;;  %v718_v39 = vpop.f32.mrb[7].mxu1 }
 0x3b5   : > { %767 = vst [vmem:[%s1959_s27 + $0x28] sm:$0xff] %v718_v39 }
 0x3b9   : > { %v1120_v40 = vpop.f32.mrb[8].mxu1 }
 0x3ba   : > { %772 = vst [vmem:[%s1959_s27 + $0x50] sm:$0xff] %v1120_v40  ;;  %v731_v41 = vpop.f32.mrb[9].mxu1 }
 0x3bb   : > { %770 = vst [vmem:[%s1959_s27 + $0x40] sm:$0xff] %v731_v41  ;;  %v1121_v42 = vpop.f32.mrb[10].mxu1 }
 0x3bc   : > { %773 = vst [vmem:[%s1959_s27 + $0x58] sm:$0xff] %v1121_v42  ;;  %v734_v43 = vpop.f32.mrb[11].mxu1 }
 0x3bd   : > { %771 = vst [vmem:[%s1959_s27 + $0x48] sm:$0xff] %v734_v43 }
 0x3c1   : > { %v1124_v44 = vpop.f32.mrb[12].mxu1 }
 0x3c2   : > { %776 = vst [vmem:[%s1959_s27 + $0x70] sm:$0xff] %v1124_v44  ;;  %v747_v45 = vpop.f32.mrb[13].mxu1 }
 0x3c3   : > { %774 = vst [vmem:[%s1959_s27 + $0x60] sm:$0xff] %v747_v45  ;;  %v1125_v47 = vpop.f32.mrb[14].mxu1 }
 0x3c4   : > { %777 = vst [vmem:[%s1959_s27 + $0x78] sm:$0xff] %v1125_v47  ;;  %v750_v48 = vpop.f32.mrb[15].mxu1 }
 0x3c5   : > { %775 = vst [vmem:[%s1959_s27 + $0x68] sm:$0xff] %v750_v48 }
 0x3c6   : > { %1402 = shalt.err (!%p1399_p5)
}
 0x3c7   : > { %s1403_s19 = scalar_lea.hbm %s1981_s5, 2048  ;;  %s1407_s6 = scalar_lea.hbm %s2040_s3, 4096 }
 0x3c8   : > { %p1404_p7 = scmp.ne.s32.totalorder %s1981_s5, %s1403_s19  ;;  %p1408_p0 = scmp.lt.u32.totalorder %s1981_s5, %s2040_s3 }
 0x3c9   : > { %p1409_p8 = scmp.lt.u32.totalorder %s1407_s6, %s1403_s19  ;;  %p1411_p12 = scmp.lt.u32.totalorder %s1403_s19, %s1981_s5 }
 0x3ca   : > { %p1405_p4 = pnand %p1404_p7, %p2073_p10 }
 0x3cb   : > { %p1410_p9 = por %p1409_p8, %p1408_p0 }
 0x3cc   : > { %p1406_p3 = pneg %p1405_p4 }
 0x3cd   : > { %p1412_p1 = por %p1411_p12, %p1410_p9 }
 0x3cf   : > { %p1413_p6 = pnand %p1412_p1, %p1406_p3 }
 0x3d1   : > { %1416 = shalt.err (!%p1413_p6)
}
 0x3d2   : > { %1132 = dma.vmem_to_hbm [thread:$0]  (%p2073_p10), %s1983_s14, 2048, %s1981_s5, %s795_s7, %s1487_s13, %s1487_s13, %s1488_s21  }
 0x3d3 PF: > { %s2074_s26 = sld [smem:[#allocation16_spill]]  ;;  %s848_s22 = sand.u32 1, %s1459_s15  }
 0x3d4   : > { %p2075_p13 = scmp.ne.s32.totalorder %s2061_s30, 0  ;;  %s849_s24 = scalar_lea.sflag [#allocation4], %s848_s22 }
 0x3d9   : > { %p2076_p11 = scmp.ge.s32.totalorder %s2074_s26, 2 }
 0x3db   : > { %p1147_p2 = pnand %p2076_p11, %p2075_p13 }
 0x3dd   : > { %1450 = dma.done.wait (!%p1147_p2), %s849_s24, 2048  }
 0x3de   : > { %1452 = vsyncadd (!%p1147_p2), %s849_s24, 4294965248  ;;  %s858_s28 = scalar_lea.sflag [#allocation10], %s848_s22 }
 0x3df   : > { %1454 = dma.done.wait (!%p1147_p2), %s858_s28, 2048  }
 0x3e0   : > { %1456 = vsyncadd (!%p1147_p2), %s858_s28, 4294965248  ;;  %s27_s20 = sadd.s32 1, %s2074_s26   ;;  %s2077_s25 = sld [smem:[#allocation18_spill]] }
 0x3e1   : > { %p24_p5 = scmp.ge.s32.totalorder %s27_s20, 4   ;;  %s2078_s18 = sld [smem:[#allocation15_spill]] }
 0x3e2   : > { %s2079_s19 = sld [smem:[#allocation17_spill]]  ;;  %s2080_s15 = smov %s1463_s16 }
 0x3e3   : > { %s2081_s16 = smov %s1467_s17  ;;  %26 = sbr.rel (!%p24_p5) target bundleno = 12 (0xc), region = 118 }
 0x3e6   : > { %s2082_s17 = smov %s2077_s25 }
 0x3ea   :  { %863 = vsyncpa [#allocation3], 1 }
 0x3eb   :  { %865 = vsyncpa [#allocation3 + $0x1], 1 }
 0x3ec   :  { %866 = vsyncpa [#allocation6], 1 }
 0x3ed   :  { %868 = vsyncpa [#allocation6 + $0x1], 1 }
 0x3ee   :  { %869 = vsyncpa [#allocation4], 1 }
 0x3ef   :  { %871 = vsyncpa [#allocation4 + $0x1], 1 }
 0x3f0   :  { %872 = vsyncpa [#allocation10], 1 }
 0x3f1   :  { %874 = vsyncpa [#allocation10 + $0x1], 1 }

</bundles_post_ra>
